<compile_context>
chip_gen: v5e
topology: v5e:2x2
jax: 0.10.0
libtpu: 0.0.40
codegen_flags: <defaults>
</compile_context>

<pallas_src>
import jax
import jax.numpy as jnp
from jax.experimental import pallas as pl
from jax.experimental.pallas import tpu as pltpu


def _project_local_style_kernel(w_ref, x_ref, o_ref):
    # w_ref: (P, C)        full weight, VMEM-resident across all grid steps
    # x_ref: (1, TN, C, D) TN consecutive n-slabs of one batch element
    # o_ref: (1, TN, P*D)  lane-dense output rows for those slabs
    w = w_ref[...]                      # (P, C)
    x = x_ref[0]                        # (TN, C, D)
    tn, c, d = x.shape
    p = w.shape[0]

    # Batched matmul over the n axis: for each slab, (P, C) @ (C, D) -> (P, D),
    # accumulated in f32 on the MXU. The broadcast of w is hoisted once per
    # grid step (JAX does not CSE broadcast_in_dim inside loops).
    wb = jnp.broadcast_to(w, (tn, p, c))
    acc = jnp.einsum("npc,ncd->npd", wb, x,
                     preferred_element_type=jnp.float32)    # (TN, P, D) f32
    acc = acc.astype(o_ref.dtype)

    # Repack to the lane-dense layout: panel p goes to lanes [p*D, (p+1)*D).
    # Static unrolled slice-stores; the lane shuffles run on the otherwise-idle
    # XLU/VPU, and the (TN, P*D) VMEM tile writes back to HBM as one dense DMA.
    for pi in range(p):
        o_ref[0, :, pi * d:(pi + 1) * d] = acc[:, pi, :]


def _pick_tn(n, c, d, itemsize, vmem_budget_bytes=24 * 1024 * 1024):
    """Number of n-slabs per grid step.

    Constraints:
      * must divide N;
      * as the second-to-last dim of the output block it must be a multiple
        of 8 or the full axis extent;
      * the double-buffered, sublane/lane-padded x block must fit in the
        VMEM budget (keeps the kernel valid/fast for large D too).
    Bigger is better for this HBM-bound kernel (amortises per-step overhead).
    """
    pad_c = -(-c // 8) * 8          # sublane padding of the C axis
    pad_d = -(-d // 128) * 128      # lane padding of the D axis
    slab_bytes = pad_c * pad_d * max(int(itemsize), 1)
    max_tn = max(1, vmem_budget_bytes // (2 * slab_bytes))   # double-buffered
    if n <= max_tn:
        return n
    best = None
    t = 8
    while t <= max_tn:
        if n % t == 0:
            best = t
        t += 8
    if best is not None:
        return best
    return n   # full extent is always a legal block dim (may exceed budget)


def project_local_style(x, weight):
    """x: (B, N, C, D); weight: (P, C) -> (B, N*P, D).

    out[b, n*P + p, d] = sum_c weight[p, c] * x[b, n, c, d]
    """
    B, N, C, D = x.shape
    P, Cw = weight.shape
    assert Cw == C, "weight in-features must match x channel dim"

    itemsize = jnp.dtype(x.dtype).itemsize
    TN = _pick_tn(N, C, D, itemsize)
    assert N % TN == 0
    grid = (B, N // TN)

    cost = pl.CostEstimate(
        flops=2 * B * N * P * C * D,
        transcendentals=0,
        bytes_accessed=itemsize * (B * N * C * D + P * C + B * N * P * D),
    )

    # Lane-dense output layout; reshaped (for free) to (B, N*P, D) below.
    out_lane_dense = pl.pallas_call(
        _project_local_style_kernel,
        out_shape=jax.ShapeDtypeStruct((B, N, P * D), x.dtype),
        grid_spec=pltpu.PrefetchScalarGridSpec(
            num_scalar_prefetch=0,
            grid=grid,
            in_specs=[
                # Full weight, same block every step (stays VMEM-resident).
                pl.BlockSpec((P, C), lambda b, nt: (0, 0)),
                # TN n-slabs of batch b; last two dims are full extents (C, D),
                # so the HBM-side read is one fully contiguous range per step.
                pl.BlockSpec((1, TN, C, D), lambda b, nt: (b, nt, 0, 0)),
            ],
            out_specs=pl.BlockSpec((1, TN, P * D), lambda b, nt: (b, nt, 0)),
        ),
        compiler_params=pltpu.CompilerParams(
            dimension_semantics=("parallel", "parallel"),
            # Double-buffered, lane-padded x block must clear v5e's 16 MiB
            # default scoped limit while leaving headroom under v7x's 64 MiB.
            vmem_limit_bytes=40 * 1024 * 1024,
        ),
        cost_estimate=cost,
    )(weight, x)

    return out_lane_dense.reshape(B, N * P, D)


if __name__ == "__main__":
    # Module hyperparameters (defaults of ProjectLocalStyle)
    pool_size = 8          # P
    local_emb_size = 257   # C (CLIP local-embedding count)

    # Small example shapes consistent with the forward pass
    B, N, C, D = 2, 2, local_emb_size, 32

    key = jax.random.PRNGKey(0)
    kx, kw = jax.random.split(key)

    x = jax.random.normal(kx, (B, N, C, D), dtype=jnp.float32)

    # Deterministic synthetic weight init (PyTorch Linear-style uniform bound)
    bound = 1.0 / jnp.sqrt(jnp.float32(local_emb_size))
    weight = jax.random.uniform(
        kw, (pool_size, local_emb_size), dtype=jnp.float32,
        minval=-bound, maxval=bound,
    )

    out = project_local_style(x, weight)
    out = jax.block_until_ready(out)

    # Pure-JAX reference of the PyTorch forward
    # out_ref[b, n*P + p, d] = sum_c W[p, c] * x[b, n, c, d]
    ref = jnp.einsum("pc,bncd->bnpd", weight, x).reshape(B, N * pool_size, D)

    assert out.shape == (B, N * pool_size, D), out.shape
    assert jnp.allclose(out, ref, atol=1e-5, rtol=1e-5), "mismatch vs reference"

    print("KERNEL_OK")
</pallas_src>

<mosaic_0001>
module attributes {stable_mosaic.version = 11 : i64} {
  func.func @_project_local_style_kernel(%arg0: i32, %arg1: i32, %arg2: memref<8x257xf32, #tpu.memory_space<vmem>>, %arg3: memref<1x2x257x32xf32, #tpu.memory_space<vmem>>, %arg4: memref<1x2x256xf32, #tpu.memory_space<vmem>>) attributes {dimension_semantics = [#tpu.dimension_semantics<parallel>, #tpu.dimension_semantics<parallel>], iteration_bounds = array<i64: 2, 1>, scalar_prefetch = 0 : i64, scratch_operands = 0 : i64, tpu.core_type = #tpu.core_type<tc>, window_params = [{pipeline_mode = #tpu.pipeline_mode<synchronous>, transform_indices = @transform_0, window_bounds = array<i64: 8, 257>}, {transform_indices = @transform_1, window_bounds = array<i64: 1, 2, 257, 32>}, {transform_indices = @transform_2, window_bounds = array<i64: 1, 2, 256>}]} {
    %c0 = arith.constant 0 : index
    %c0_0 = arith.constant 0 : index
    %0 = vector.load %arg2[%c0, %c0_0] : memref<8x257xf32, #tpu.memory_space<vmem>>, vector<8x257xf32>
    %c0_1 = arith.constant 0 : index
    %c0_2 = arith.constant 0 : index
    %c0_3 = arith.constant 0 : index
    %c0_4 = arith.constant 0 : index
    %1 = vector.load %arg3[%c0_1, %c0_2, %c0_3, %c0_4] : memref<1x2x257x32xf32, #tpu.memory_space<vmem>>, vector<1x2x257x32xf32>
    %2 = vector.shape_cast %1 : vector<1x2x257x32xf32> to vector<2x257x32xf32>
    %3 = vector.shape_cast %0 : vector<8x257xf32> to vector<1x8x257xf32>
    %4 = vector.broadcast %3 : vector<1x8x257xf32> to vector<2x8x257xf32>
    "tpu.trace_start"() <{level = 10 : i32, message = "npc,ncd->npd"}> : () -> ()
    %cst = arith.constant dense<0.000000e+00> : vector<2x8x32xf32>
    %5 = tpu.matmul %4, %2, %cst {dimension_numbers = #tpu.dot_dimension_numbers<[2], [1], [1], [2], [0, 0, 0, 1, 1, 2], [0], [0]>} : vector<2x8x257xf32>, vector<2x257x32xf32>, vector<2x8x32xf32> -> vector<2x8x32xf32>
    "tpu.trace_stop"() : () -> ()
    %6 = vector.extract_strided_slice %5 {offsets = [0, 0, 0], sizes = [2, 1, 32], strides = [1, 1, 1]} : vector<2x8x32xf32> to vector<2x1x32xf32>
    %7 = vector.shape_cast %6 : vector<2x1x32xf32> to vector<2x32xf32>
    %c0_5 = arith.constant 0 : index
    %c0_6 = arith.constant 0 : index
    %c0_7 = arith.constant 0 : index
    %8 = vector.load %arg4[%c0_5, %c0_6, %c0_7] : memref<1x2x256xf32, #tpu.memory_space<vmem>>, vector<1x2x32xf32>
    %9 = vector.shape_cast %8 : vector<1x2x32xf32> to vector<2x32xf32>
    %10 = vector.shape_cast %7 : vector<2x32xf32> to vector<1x2x32xf32>
    tpu.vector_store %arg4[%c0_5, %c0_6, %c0_7], %10 {strides = array<i32>} : memref<1x2x256xf32, #tpu.memory_space<vmem>>, vector<1x2x32xf32>,
    %11 = vector.extract_strided_slice %5 {offsets = [0, 1, 0], sizes = [2, 1, 32], strides = [1, 1, 1]} : vector<2x8x32xf32> to vector<2x1x32xf32>
    %12 = vector.shape_cast %11 : vector<2x1x32xf32> to vector<2x32xf32>
    %c0_8 = arith.constant 0 : index
    %c0_9 = arith.constant 0 : index
    %c32 = arith.constant 32 : index
    %13 = vector.load %arg4[%c0_8, %c0_9, %c32] : memref<1x2x256xf32, #tpu.memory_space<vmem>>, vector<1x2x32xf32>
    %14 = vector.shape_cast %13 : vector<1x2x32xf32> to vector<2x32xf32>
    %15 = vector.shape_cast %12 : vector<2x32xf32> to vector<1x2x32xf32>
    tpu.vector_store %arg4[%c0_8, %c0_9, %c32], %15 {strides = array<i32>} : memref<1x2x256xf32, #tpu.memory_space<vmem>>, vector<1x2x32xf32>,
    %16 = vector.extract_strided_slice %5 {offsets = [0, 2, 0], sizes = [2, 1, 32], strides = [1, 1, 1]} : vector<2x8x32xf32> to vector<2x1x32xf32>
    %17 = vector.shape_cast %16 : vector<2x1x32xf32> to vector<2x32xf32>
    %c0_10 = arith.constant 0 : index
    %c0_11 = arith.constant 0 : index
    %c64 = arith.constant 64 : index
    %18 = vector.load %arg4[%c0_10, %c0_11, %c64] : memref<1x2x256xf32, #tpu.memory_space<vmem>>, vector<1x2x32xf32>
    %19 = vector.shape_cast %18 : vector<1x2x32xf32> to vector<2x32xf32>
    %20 = vector.shape_cast %17 : vector<2x32xf32> to vector<1x2x32xf32>
    tpu.vector_store %arg4[%c0_10, %c0_11, %c64], %20 {strides = array<i32>} : memref<1x2x256xf32, #tpu.memory_space<vmem>>, vector<1x2x32xf32>,
    %21 = vector.extract_strided_slice %5 {offsets = [0, 3, 0], sizes = [2, 1, 32], strides = [1, 1, 1]} : vector<2x8x32xf32> to vector<2x1x32xf32>
    %22 = vector.shape_cast %21 : vector<2x1x32xf32> to vector<2x32xf32>
    %c0_12 = arith.constant 0 : index
    %c0_13 = arith.constant 0 : index
    %c96 = arith.constant 96 : index
    %23 = vector.load %arg4[%c0_12, %c0_13, %c96] : memref<1x2x256xf32, #tpu.memory_space<vmem>>, vector<1x2x32xf32>
    %24 = vector.shape_cast %23 : vector<1x2x32xf32> to vector<2x32xf32>
    %25 = vector.shape_cast %22 : vector<2x32xf32> to vector<1x2x32xf32>
    tpu.vector_store %arg4[%c0_12, %c0_13, %c96], %25 {strides = array<i32>} : memref<1x2x256xf32, #tpu.memory_space<vmem>>, vector<1x2x32xf32>,
    %26 = vector.extract_strided_slice %5 {offsets = [0, 4, 0], sizes = [2, 1, 32], strides = [1, 1, 1]} : vector<2x8x32xf32> to vector<2x1x32xf32>
    %27 = vector.shape_cast %26 : vector<2x1x32xf32> to vector<2x32xf32>
    %c0_14 = arith.constant 0 : index
    %c0_15 = arith.constant 0 : index
    %c128 = arith.constant 128 : index
    %28 = vector.load %arg4[%c0_14, %c0_15, %c128] : memref<1x2x256xf32, #tpu.memory_space<vmem>>, vector<1x2x32xf32>
    %29 = vector.shape_cast %28 : vector<1x2x32xf32> to vector<2x32xf32>
    %30 = vector.shape_cast %27 : vector<2x32xf32> to vector<1x2x32xf32>
    tpu.vector_store %arg4[%c0_14, %c0_15, %c128], %30 {strides = array<i32>} : memref<1x2x256xf32, #tpu.memory_space<vmem>>, vector<1x2x32xf32>,
    %31 = vector.extract_strided_slice %5 {offsets = [0, 5, 0], sizes = [2, 1, 32], strides = [1, 1, 1]} : vector<2x8x32xf32> to vector<2x1x32xf32>
    %32 = vector.shape_cast %31 : vector<2x1x32xf32> to vector<2x32xf32>
    %c0_16 = arith.constant 0 : index
    %c0_17 = arith.constant 0 : index
    %c160 = arith.constant 160 : index
    %33 = vector.load %arg4[%c0_16, %c0_17, %c160] : memref<1x2x256xf32, #tpu.memory_space<vmem>>, vector<1x2x32xf32>
    %34 = vector.shape_cast %33 : vector<1x2x32xf32> to vector<2x32xf32>
    %35 = vector.shape_cast %32 : vector<2x32xf32> to vector<1x2x32xf32>
    tpu.vector_store %arg4[%c0_16, %c0_17, %c160], %35 {strides = array<i32>} : memref<1x2x256xf32, #tpu.memory_space<vmem>>, vector<1x2x32xf32>,
    %36 = vector.extract_strided_slice %5 {offsets = [0, 6, 0], sizes = [2, 1, 32], strides = [1, 1, 1]} : vector<2x8x32xf32> to vector<2x1x32xf32>
    %37 = vector.shape_cast %36 : vector<2x1x32xf32> to vector<2x32xf32>
    %c0_18 = arith.constant 0 : index
    %c0_19 = arith.constant 0 : index
    %c192 = arith.constant 192 : index
    %38 = vector.load %arg4[%c0_18, %c0_19, %c192] : memref<1x2x256xf32, #tpu.memory_space<vmem>>, vector<1x2x32xf32>
    %39 = vector.shape_cast %38 : vector<1x2x32xf32> to vector<2x32xf32>
    %40 = vector.shape_cast %37 : vector<2x32xf32> to vector<1x2x32xf32>
    tpu.vector_store %arg4[%c0_18, %c0_19, %c192], %40 {strides = array<i32>} : memref<1x2x256xf32, #tpu.memory_space<vmem>>, vector<1x2x32xf32>,
    %41 = vector.extract_strided_slice %5 {offsets = [0, 7, 0], sizes = [2, 1, 32], strides = [1, 1, 1]} : vector<2x8x32xf32> to vector<2x1x32xf32>
    %42 = vector.shape_cast %41 : vector<2x1x32xf32> to vector<2x32xf32>
    %c0_20 = arith.constant 0 : index
    %c0_21 = arith.constant 0 : index
    %c224 = arith.constant 224 : index
    %43 = vector.load %arg4[%c0_20, %c0_21, %c224] : memref<1x2x256xf32, #tpu.memory_space<vmem>>, vector<1x2x32xf32>
    %44 = vector.shape_cast %43 : vector<1x2x32xf32> to vector<2x32xf32>
    %45 = vector.shape_cast %42 : vector<2x32xf32> to vector<1x2x32xf32>
    tpu.vector_store %arg4[%c0_20, %c0_21, %c224], %45 {strides = array<i32>} : memref<1x2x256xf32, #tpu.memory_space<vmem>>, vector<1x2x32xf32>,
    return
  }
  func.func @transform_0(%arg0: i32, %arg1: i32) -> (i32, i32) {
    %c0_i32 = arith.constant 0 : i32
    %c0_i32_0 = arith.constant 0 : i32
    %c0_i32_1 = arith.constant 0 : i32
    return %c0_i32, %c0_i32_0 : i32, i32
  }
  func.func @transform_1(%arg0: i32, %arg1: i32) -> (i32, i32, i32, i32) {
    %c0_i32 = arith.constant 0 : i32
    %c0_i32_0 = arith.constant 0 : i32
    %c0_i32_1 = arith.constant 0 : i32
    return %arg0, %arg1, %c0_i32, %c0_i32_0 : i32, i32, i32, i32
  }
  func.func @transform_2(%arg0: i32, %arg1: i32) -> (i32, i32, i32) {
    %c0_i32 = arith.constant 0 : i32
    %c0_i32_0 = arith.constant 0 : i32
    return %arg0, %arg1, %c0_i32 : i32, i32, i32
  }
}

</mosaic_0001>

<bundles_post_ra>
// kernel: tpu_custom_call.1
= control target key start
LH: loop header
LB: loop body
LE: loop exit
PB: predicated region body
PF: predicated region fallthrough
CT: control target
= control target key end

     0   :  { %7 = vsyncpa [#allocation3], 0  ;;  %s1039_s0 = inlined_call_operand.vmem [shape: f32[8,257], index: 0, kind: input, shape index: {}]   ;;  %s1040_s1 = inlined_call_operand.vmem [shape: f32[2,2,257,32], index: 1, kind: input, shape index: {}]   ;;  %s1041_s2 = inlined_call_operand.hbm [shape: f32[2,2,256], index: 2, kind: output, shape index: {}]  }
   0x1   :  { %9 = vsyncpa [#allocation3 + $0x1], 0  ;;  %s779_s9 = smov 0   ;;  %s781_s10 = smov 0  }
   0x2   :  { %s783_s11 = smov 0   ;;  %s785_s12 = smov 0  }
   0x3   :  { %s787_s13 = smov 0   ;;  %s789_s14 = smov 0  }
   0x4 LB: > { %s605_s15 = sadd.s32 4294967295, %s759_s14   ;;  %s606_s16 = sadd.s32 4294967294, %s759_s14   ;;  %s759_s14 = sphi %s789_s14, %s15_s14   ;;  %s755_s13 = sphi %s787_s13, %s1048_s13   ;;  %s751_s12 = sphi %s785_s12, %s1047_s12   ;;  %s747_s11 = sphi %s783_s11, %s1046_s11   ;;  %s743_s10 = sphi %s781_s10, %s1045_s10   ;;  %s739_s9 = sphi %s779_s9, %s1044_s9  }
   0x5   : > { %s27_s17 = sadd.s32 1, %s755_s13  ;;  %s85_s18 = sadd.s32 1, %s747_s11 }
   0x6   : > { %p29_p0 = scmp.ge.s32.totalorder %s27_s17, 2  ;;  %p95_p1 = scmp.ne.s32.totalorder %s747_s11, %s743_s10 }
   0x7   : > { %p96_p2 = scmp.eq.s32.totalorder %s605_s15, 1  ;;  %p101_p3 = scmp.ne.s32.totalorder %s743_s10, %s739_s9 }
   0x8   : > { %s1050_s17 = smov (%p29_p0, %s27_s17), 0  ;;  %p102_p5 = scmp.eq.s32.totalorder %s606_s16, 1 }
   0x9   : > { %p819_p4 = por %p96_p2, %p95_p1  ;;  %s80_s20 = ssub.s32 %s755_s13, %s1050_s17 }
   0xa   : > { %p609_p6 = scmp.ge.s32.totalorder %s759_s14, 1  ;;  %p83_p7 = scmp.eq.s32.totalorder %s80_s20, 0 }
   0xb   : > { %p826_p8 = por %p102_p5, %p101_p3  ;;  %p137_p9 = scmp.lt.s32.totalorder %s759_s14, 3 }
   0xc   : > { %s832_s22 = scalar_select %p83_p7, %s747_s11, %s85_s18  }
   0xd   : > { %p138_p10 = pnand %p609_p6, %p137_p9 }
   0xe   : > { %p165_p11 = scmp.lt.s32.totalorder (!%p138_p10), %s751_s12, 1  ;;  %s161_s6 = sand.u32 (!%p138_p10), 1, %s743_s10  }
   0xf   : > { %141 = sbr.rel (%p138_p10) target bundleno = 361 (0x169), region = 28  ;;  %s610_s7 = sshll.u32 (!%p138_p10), %s161_s6, 2 }
  0x10   : > { %s761_s8 = smov (!%p138_p10), 32   ;;  %s946_s15 = scalar_lea.vmem (!%p138_p10), [#allocation2], %s610_s7 }
  0x11   : > { %s762_s16 = smov (!%p138_p10), 64   ;;  %s763_s18 = smov (!%p138_p10), 96  }
  0x12   : > { %s621_s20 = sshll.u32 (!%p138_p10), %s751_s12, 2  ;;  %s523_s26 = sshll.u32 (!%p138_p10), %s946_s15, 4  ;;  %s524_s26 = int_to_ptr.vmem [resolvable:$true] %s523_s26 }
  0x13   : > { %s521_s25 = scalar_lea.hbm (!%p138_p10), %s1041_s2, %s621_s20  ;;  %s508_s28 = scalar_lea.sflag (!%p138_p10), [#allocation3], %s161_s6 }
  0x14   : > { %s166_s23 = scalar_select %p165_p11, %s751_s12, 1  ;;  %vm248_vm0 = vcmask 1040384   ;;  %v177_v51 = vld [vmem:[%s1039_s0 + $0x10] sm:$0xff]  ;;  %vm244_vm1 = vcmask 7168   ;;  %vm382_vm2 = vcmask 1041409   ;;  %vm384_vm3 = vcmask 1043459  }
  0x15   : > { %vm386_vm4 = vcmask 1045509   ;;  %vm388_vm5 = vcmask 1047559   ;;  %vm391_vm6 = vcmask 254976   ;;  %vm403_vm7 = vcmask 517376   ;;  %s701_s4 = scalar_lea.hbm %s1041_s2, 8 }
  0x16   : > { %s622_s24 = smul.u32 528, %s166_s23  ;;  %vm421_vm8 = vcmask 779776   ;;  %vm439_vm9 = vcmask 1042176  }
  0x18   : > { %s839_s27 = scalar_lea.vmem %s1040_s1, %s622_s24 }
  0x19   : > { %v193_v0 = vld [vmem:[%s839_s27 + $0x78] sm:$0xff]  ;;  %v210_v2 = vld [vmem:[%s839_s27 + $0x100] sm:$0x1]  ;;  %v192_v5 = vld [vmem:[%s839_s27 + $0x70] sm:$0xff] }
  0x1a   : > { %v209_v1 = vld [vmem:[%s839_s27 + $0xf8] sm:$0xff]  ;;  %252 = vmatpush.msra.mxu0 %v193_v0  ;;  %v226_v3 = vld [vmem:[%s839_s27 + $0x180] sm:$0xff]  ;;  %612 = vmatpush.msk.msra.mxu2 %vm248_vm0, %v210_v2  ;;  %v208_v6 = vld [vmem:[%s839_s27 + $0xf0] sm:$0xff] }
  0x1b   : > { %272 = vmatpush.msra.mxu1 %v209_v1  ;;  %v242_v4 = vld [vmem:[%s839_s27 + $0x200] sm:$0xff]  ;;  %315 = vmatpush.msra.mxu3 %v226_v3  ;;  %v225_v7 = vld [vmem:[%s839_s27 + $0x178] sm:$0xff]  ;;  %v191_v9 = vld [vmem:[%s839_s27 + $0x68] sm:$0xff] }
  0x1c   : > { %v241_v8 = vld [vmem:[%s839_s27 + $0x1f8] sm:$0xff]  ;;  %335 = vmatpush.msrb.mxu2 %v242_v4  ;;  %253 = vmatpush.msra.mxu0 %v192_v5  ;;  %v207_v10 = vld [vmem:[%s839_s27 + $0xe8] sm:$0xff]  ;;  %v224_v11 = vld [vmem:[%s839_s27 + $0x170] sm:$0xff] }
  0x1d   : > { %273 = vmatpush.msra.mxu1 %v208_v6  ;;  %316 = vmatpush.msra.mxu3 %v225_v7  ;;  %v240_v12 = vld [vmem:[%s839_s27 + $0x1f0] sm:$0xff]  ;;  %v190_v13 = vld [vmem:[%s839_s27 + $0x60] sm:$0xff]  ;;  %v223_v15 = vld [vmem:[%s839_s27 + $0x168] sm:$0xff] }
  0x1e   : > { %336 = vmatpush.msrb.mxu2 %v241_v8  ;;  %254 = vmatpush.msra.mxu0 %v191_v9  ;;  %v206_v14 = vld [vmem:[%s839_s27 + $0xe0] sm:$0xff]  ;;  %v239_v16 = vld [vmem:[%s839_s27 + $0x1e8] sm:$0xff]  ;;  %v189_v17 = vld [vmem:[%s839_s27 + $0x58] sm:$0xff] }
  0x1f   : > { %274 = vmatpush.msra.mxu1 %v207_v10  ;;  %317 = vmatpush.msra.mxu3 %v224_v11  ;;  %v205_v18 = vld [vmem:[%s839_s27 + $0xd8] sm:$0xff]  ;;  %v222_v19 = vld [vmem:[%s839_s27 + $0x160] sm:$0xff]  ;;  %v188_v21 = vld [vmem:[%s839_s27 + $0x50] sm:$0xff] }
  0x20   : > { %337 = vmatpush.msrb.mxu2 %v240_v12  ;;  %255 = vmatpush.msra.mxu0 %v190_v13  ;;  %v238_v20 = vld [vmem:[%s839_s27 + $0x1e0] sm:$0xff]  ;;  %v204_v22 = vld [vmem:[%s839_s27 + $0xd0] sm:$0xff]  ;;  %v221_v23 = vld [vmem:[%s839_s27 + $0x158] sm:$0xff] }
  0x21   : > { %275 = vmatpush.msra.mxu1 %v206_v14  ;;  %318 = vmatpush.msra.mxu3 %v223_v15  ;;  %v237_v24 = vld [vmem:[%s839_s27 + $0x1d8] sm:$0xff]  ;;  %v187_v25 = vld [vmem:[%s839_s27 + $0x48] sm:$0xff]  ;;  %v220_v27 = vld [vmem:[%s839_s27 + $0x150] sm:$0xff] }
  0x22   : > { %338 = vmatpush.msrb.mxu2 %v239_v16  ;;  %256 = vmatpush.msra.mxu0 %v189_v17  ;;  %v203_v26 = vld [vmem:[%s839_s27 + $0xc8] sm:$0xff]  ;;  %v236_v28 = vld [vmem:[%s839_s27 + $0x1d0] sm:$0xff]  ;;  %v186_v29 = vld [vmem:[%s839_s27 + $0x40] sm:$0xff] }
  0x23   : > { %276 = vmatpush.msra.mxu1 %v205_v18  ;;  %319 = vmatpush.msra.mxu3 %v222_v19  ;;  %v202_v30 = vld [vmem:[%s839_s27 + $0xc0] sm:$0xff]  ;;  %v219_v31 = vld [vmem:[%s839_s27 + $0x148] sm:$0xff]  ;;  %v185_v33 = vld [vmem:[%s839_s27 + $0x38] sm:$0xff] }
  0x24   : > { %339 = vmatpush.msrb.mxu2 %v238_v20  ;;  %257 = vmatpush.msra.mxu0 %v188_v21  ;;  %v235_v32 = vld [vmem:[%s839_s27 + $0x1c8] sm:$0xff]  ;;  %v201_v34 = vld [vmem:[%s839_s27 + $0xb8] sm:$0xff]  ;;  %v218_v35 = vld [vmem:[%s839_s27 + $0x140] sm:$0xff] }
  0x25   : > { %277 = vmatpush.msra.mxu1 %v204_v22  ;;  %320 = vmatpush.msra.mxu3 %v221_v23  ;;  %v234_v36 = vld [vmem:[%s839_s27 + $0x1c0] sm:$0xff]  ;;  %v184_v37 = vld [vmem:[%s839_s27 + $0x30] sm:$0xff]  ;;  %v217_v39 = vld [vmem:[%s839_s27 + $0x138] sm:$0xff] }
  0x26   : > { %340 = vmatpush.msrb.mxu2 %v237_v24  ;;  %258 = vmatpush.msra.mxu0 %v187_v25  ;;  %v200_v38 = vld [vmem:[%s839_s27 + $0xb0] sm:$0xff]  ;;  %v233_v40 = vld [vmem:[%s839_s27 + $0x1b8] sm:$0xff]  ;;  %v183_v41 = vld [vmem:[%s839_s27 + $0x28] sm:$0xff] }
  0x27   : > { %278 = vmatpush.msra.mxu1 %v203_v26  ;;  %321 = vmatpush.msra.mxu3 %v220_v27  ;;  %v199_v42 = vld [vmem:[%s839_s27 + $0xa8] sm:$0xff]  ;;  %v216_v43 = vld [vmem:[%s839_s27 + $0x130] sm:$0xff]  ;;  %v182_v45 = vld [vmem:[%s839_s27 + $0x20] sm:$0xff] }
  0x28   : > { %341 = vmatpush.msrb.mxu2 %v236_v28  ;;  %259 = vmatpush.msra.mxu0 %v186_v29  ;;  %v232_v44 = vld [vmem:[%s839_s27 + $0x1b0] sm:$0xff]  ;;  %v198_v46 = vld [vmem:[%s839_s27 + $0xa0] sm:$0xff]  ;;  %v215_v47 = vld [vmem:[%s839_s27 + $0x128] sm:$0xff] }
  0x29   : > { %279 = vmatpush.msra.mxu1 %v202_v30  ;;  %322 = vmatpush.msra.mxu3 %v219_v31  ;;  %v231_v48 = vld [vmem:[%s839_s27 + $0x1a8] sm:$0xff]  ;;  %v181_v49 = vld [vmem:[%s839_s27 + $0x18] sm:$0xff]  ;;  %v214_v52 = vld [vmem:[%s839_s27 + $0x120] sm:$0xff] }
  0x2a   : > { %342 = vmatpush.msrb.mxu2 %v235_v32  ;;  %260 = vmatpush.msra.mxu0 %v185_v33  ;;  %v197_v50 = vld [vmem:[%s839_s27 + $0x98] sm:$0xff]  ;;  %v230_v53 = vld [vmem:[%s839_s27 + $0x1a0] sm:$0xff]  ;;  %v180_v54 = vld [vmem:[%s839_s27 + $0x10] sm:$0xff] }
  0x2b   : > { %280 = vmatpush.msra.mxu1 %v201_v34  ;;  %323 = vmatpush.msra.mxu3 %v218_v35  ;;  %v196_v55 = vld [vmem:[%s839_s27 + $0x90] sm:$0xff]  ;;  %v213_v56 = vld [vmem:[%s839_s27 + $0x118] sm:$0xff]  ;;  %v179_v58 = vld [vmem:[%s839_s27 + $0x8] sm:$0xff] }
  0x2c   : > { %343 = vmatpush.msrb.mxu2 %v234_v36  ;;  %261 = vmatpush.msra.mxu0 %v184_v37  ;;  %v229_v57 = vld [vmem:[%s839_s27 + $0x198] sm:$0xff]  ;;  %v195_v59 = vld [vmem:[%s839_s27 + $0x88] sm:$0xff]  ;;  %v212_v60 = vld [vmem:[%s839_s27 + $0x110] sm:$0xff] }
  0x2d   : > { %281 = vmatpush.msra.mxu1 %v200_v38  ;;  %324 = vmatpush.msra.mxu3 %v217_v39  ;;  %v228_v61 = vld [vmem:[%s839_s27 + $0x190] sm:$0xff]  ;;  %v178_v62 = vld [vmem:[%s839_s27] sm:$0xff]  ;;  %v176_v1 = vld [vmem:[%s1039_s0 + $0x8] sm:$0xff] }
  0x2e   : > { %344 = vmatpush.msrb.mxu2 %v233_v40  ;;  %262 = vmatpush.msra.mxu0 %v183_v41  ;;  %v194_v63 = vld [vmem:[%s839_s27 + $0x80] sm:$0xff]  ;;  %v211_v2 = vld [vmem:[%s839_s27 + $0x108] sm:$0xff] }
  0x2f   : > { %282 = vmatpush.msra.mxu1 %v199_v42  ;;  %325 = vmatpush.msra.mxu3 %v216_v43  ;;  %v175_v0 = vld [vmem:[%s1039_s0] sm:$0xff]  ;;  %v227_v3 = vld [vmem:[%s839_s27 + $0x188] sm:$0xff] }
  0x30   : > { %345 = vmatpush.msrb.mxu2 %v232_v44  ;;  %263 = vmatpush.msra.mxu0 %v182_v45  ;;  %v243_v4 = vld [vmem:[%s839_s27 + $0x208] sm:$0x1]  ;;  %s525_s27 = sshll.u32 %s521_s25, 4  ;;  %s526_s27 = int_to_ptr.hbm [resolvable:$true] %s525_s27 }
  0x31   : > { %283 = vmatpush.msra.mxu1 %v198_v46  ;;  %326 = vmatpush.msra.mxu3 %v215_v47  ;;  %s695_s29 = sshra.s32 %s526_s27, 4  ;;  %s696_s29 = int_to_ptr.hbm [resolvable:$true] %s695_s29 }
  0x32   : > { %346 = vmatpush.msrb.mxu2 %v231_v48  ;;  %264 = vmatpush.msra.mxu0 %v181_v49  ;;  %s697_s30 = scalar_lea.hbm %s696_s29, 4  ;;  %p702_p1 = scmp.lt.s32.totalorder %s696_s29, %s1041_s2 }
  0x33   : > { %284 = vmatpush.msra.mxu1 %v197_v50  ;;  %613 = vmatmul.msk.f32.vlgmr.msra.gmra.mxu2 %vm244_vm1, %v177_v51  ;;  %p698_p12 = scmp.ne.s32.totalorder %s696_s29, %s697_s30  ;;  %p703_p2 = scmp.lt.s32.totalorder %s701_s4, %s697_s30 }
  0x34   : > { %327 = vmatpush.msra.mxu3 %v214_v52  ;;  %347 = vmatpush.msrb.mxu2 %v230_v53 }
  0x35   : > { %265 = vmatpush.msra.mxu0 %v180_v54  ;;  %285 = vmatpush.msra.mxu1 %v196_v55  ;;  %p699_p13 = pnand %p698_p12, %p819_p4  ;;  %p704_p3 = por %p703_p2, %p702_p1 }
  0x36   : > { %328 = vmatpush.msra.mxu3 %v213_v56  ;;  %348 = vmatpush.msrb.mxu2 %v229_v57 }
  0x37   : > { %266 = vmatpush.msra.mxu0 %v179_v58  ;;  %286 = vmatpush.msra.mxu1 %v195_v59  ;;  %p700_p0 = pneg %p699_p13 }
  0x38   : > { %329 = vmatpush.msra.mxu3 %v212_v60  ;;  %349 = vmatpush.msrb.mxu2 %v228_v61 }
  0x39   : > { %267 = vmatpush.msra.mxu0 %v178_v62  ;;  %287 = vmatpush.msra.mxu1 %v194_v63  ;;  %p705_p5 = pnand %p704_p3, %p700_p0 }
  0x3a   : > { %268 = vmatmul.f32.vlgmr.msra.gmra.mxu0 %v175_v0  ;;  %288 = vmatmul.f32.vlgmr.msra.gmra.mxu1 %v176_v1 }
  0x3b   : > { %330 = vmatpush.msra.mxu3 %v211_v2  ;;  %350 = vmatpush.msrb.mxu2 %v227_v3 }
  0x3c   : > { %331 = vmatmul.f32.vlgmr.msra.gmra.mxu3 %v175_v0  ;;  %351 = vmatmul.f32.vlgmr.msrb.gmra.mxu2 %v176_v1 }
  0x3d   : > { %614 = vmatpush.msk.msrb.mxu0 %vm248_vm0, %v243_v4 }
  0x42   : > { %615 = vmatmul.msk.f32.vlgmr.msrb.gmra.mxu0 %vm244_vm1, %v177_v51 }
  0xb6   : > { %v309_v5 = vpop.f32.mrf.mxu2 }
  0xb7   : > { %v269_v6 = vpop.f32.mrf.mxu0  ;;  %v289_v7 = vpop.f32.mrf.mxu1 }
  0xb8   : > { %v290_v8 = vadd.f32 %v289_v7, %v269_v6 }
  0xba   : > { %v920_v9 = vadd.f32 %v309_v5, %v290_v8 }
  0xbc   : > { %405 = vst.sshfl [vmem:[#allocation1] sm:$0xff pattern:$0x73625140] %v920_v9  ;;  %v393_v15 = vrot.slane %v920_v9, 1 }
  0xbf   : > { %v332_v10 = vpop.f32.mrf.mxu3  ;;  %v352_v11 = vpop.f32.mrf.mxu2 }
  0xc0   : > { %v353_v12 = vadd.f32 %v352_v11, %v332_v10  ;;  %v372_v13 = vpop.f32.mrf.mxu0 }
  0xc2   : > { %v924_v14 = vadd.f32 %v372_v13, %v353_v12 }
  0xc3   : > { %v407_v16 = vld [vmem:[#allocation1 + $0x1] ss:$4 sm:$0xff] }
  0xc4   : > { %408 = vst.sshfl [vmem:[#allocation1 + $0x20] sm:$0xff pattern:$0x73625140] %v924_v14  ;;  %v396_v17 = vsel %vm382_vm2, %v924_v14, %v393_v15  ;;  %v381_v18 = vrot.slane %v924_v14, 7 }
  0xc5   : > { %v397_v19 = vsel %vm384_vm3, %v924_v14, %v396_v17  ;;  %423 = vst.sshfl [vmem:[#allocation1] sm:$0xff pattern:$0x73625140] %v920_v9 }
  0xc6   : > { %v398_v20 = vsel %vm386_vm4, %v924_v14, %v397_v19  ;;  %v383_v21 = vsel %vm382_vm2, %v381_v18, %v920_v9 }
  0xc7   : > { %v399_v22 = vsel %vm388_vm5, %v924_v14, %v398_v20  ;;  %v385_v23 = vsel %vm384_vm3, %v381_v18, %v383_v21 }
  0xc8   : > { %400 = vrot.lane.b32.xlu0 %v399_v22, %s761_s8  ;;  %v387_v24 = vsel %vm386_vm4, %v381_v18, %v385_v23 }
  0xc9   : > { %v389_v25 = vsel %vm388_vm5, %v381_v18, %v387_v24 }
  0xca   : > { %392 = vst.msk [vmem:[%s946_s15] sm:$0x3] %vm391_vm6, %v389_v25 }
  0xcb   : > { %v410_v26 = vld [vmem:[#allocation1 + $0x21] ss:$4 sm:$0xff] }
  0xcc   : > { %v413_v27 = vrot.slane %v410_v26, 7  ;;  %426 = vst.sshfl [vmem:[#allocation1 + $0x20] sm:$0xff pattern:$0x73625140] %v924_v14  ;;  %v425_v28 = vld [vmem:[#allocation1 + $0x1] ss:$4 sm:$0xff] }
  0xcd   : > { %441 = vst.sshfl [vmem:[#allocation1] sm:$0xff pattern:$0x73625140] %v920_v9  ;;  %v429_v33 = vrot.slane %v425_v28, 1 }
  0xce   : > { %v414_v29 = vsel %vm382_vm2, %v413_v27, %v407_v16 }
  0xcf   : > { %v415_v30 = vsel %vm384_vm3, %v413_v27, %v414_v29 }
  0xd0   : > { %v416_v31 = vsel %vm386_vm4, %v413_v27, %v415_v30 }
  0xd1   : > { %v417_v32 = vsel %vm388_vm5, %v413_v27, %v416_v31 }
  0xd2   : > { %418 = vrot.lane.b32.xlu1 %v417_v32, %s762_s16 }
  0xd3   : > { %v428_v34 = vld [vmem:[#allocation1 + $0x21] ss:$4 sm:$0xff] }
  0xd4   : > { %v432_v35 = vsel %vm382_vm2, %v428_v34, %v429_v33  ;;  %v443_v36 = vld [vmem:[#allocation1 + $0x2] ss:$4 sm:$0xff]  ;;  %444 = vst.sshfl [vmem:[#allocation1 + $0x20] sm:$0xff pattern:$0x73625140] %v924_v14 }
  0xd5   : > { %v433_v37 = vsel %vm384_vm3, %v428_v34, %v432_v35  ;;  %456 = vst.sshfl [vmem:[#allocation1] sm:$0xff pattern:$0x73625140] %v920_v9 }
  0xd6   : > { %v434_v38 = vsel %vm386_vm4, %v428_v34, %v433_v37 }
  0xd7   : > { %v435_v39 = vsel %vm388_vm5, %v428_v34, %v434_v38 }
  0xd8   : > { %436 = vrot.lane.b32.xlu2 %v435_v39, %s763_s18 }
  0xdb   : > { %v446_v40 = vld [vmem:[#allocation1 + $0x22] ss:$4 sm:$0xff] }
  0xdc   : > { %v458_v41 = vld [vmem:[#allocation1 + $0x2] ss:$4 sm:$0xff]  ;;  %459 = vst.sshfl [vmem:[#allocation1 + $0x20] sm:$0xff pattern:$0x73625140] %v924_v14  ;;  %v449_v42 = vrot.slane %v446_v40, 7 }
  0xdd   : > { %473 = vst.sshfl [vmem:[#allocation1] sm:$0xff pattern:$0x73625140] %v920_v9  ;;  %v462_v47 = vrot.slane %v458_v41, 1 }
  0xde   : > { %v450_v43 = vsel %vm382_vm2, %v449_v42, %v443_v36 }
  0xdf   : > { %v451_v44 = vsel %vm384_vm3, %v449_v42, %v450_v43 }
  0xe0   : > { %v452_v45 = vsel %vm386_vm4, %v449_v42, %v451_v44 }
  0xe1   : > { %v453_v46 = vsel %vm388_vm5, %v449_v42, %v452_v45 }
  0xe2   : > { %455 = vst.msk [vmem:[%s946_s15 + $0x2] sm:$0x3] %vm391_vm6, %v453_v46 }
  0xe3   : > { %v461_v48 = vld [vmem:[#allocation1 + $0x22] ss:$4 sm:$0xff] }
  0xe4   : > { %v465_v49 = vsel %vm382_vm2, %v461_v48, %v462_v47  ;;  %476 = vst.sshfl [vmem:[#allocation1 + $0x20] sm:$0xff pattern:$0x73625140] %v924_v14  ;;  %v475_v50 = vld [vmem:[#allocation1 + $0x3] ss:$4 sm:$0xff] }
  0xe5   : > { %v466_v51 = vsel %vm384_vm3, %v461_v48, %v465_v49  ;;  %490 = vst.sshfl [vmem:[#allocation1] sm:$0xff pattern:$0x73625140] %v920_v9 }
  0xe6   : > { %v467_v52 = vsel %vm386_vm4, %v461_v48, %v466_v51 }
  0xe7   : > { %v468_v53 = vsel %vm388_vm5, %v461_v48, %v467_v52 }
  0xe8   : > { %469 = vrot.lane.b32.xlu0 %v468_v53, %s761_s8 }
  0xeb   : > { %v478_v54 = vld [vmem:[#allocation1 + $0x23] ss:$4 sm:$0xff] }
  0xec   : > { %v481_v55 = vrot.slane %v478_v54, 7  ;;  %493 = vst.sshfl [vmem:[#allocation1 + $0x20] sm:$0xff pattern:$0x73625140] %v924_v14  ;;  %v492_v58 = vld [vmem:[#allocation1 + $0x3] ss:$4 sm:$0xff] }
  0xed   : > { %v496_v61 = vrot.slane %v492_v58, 1 }
  0xee   : > { %v482_v56 = vsel %vm382_vm2, %v481_v55, %v475_v50 }
  0xef   : > { %v483_v57 = vsel %vm384_vm3, %v481_v55, %v482_v56 }
  0xf0   : > { %v484_v59 = vsel %vm386_vm4, %v481_v55, %v483_v57 }
  0xf1   : > { %v485_v60 = vsel %vm388_vm5, %v481_v55, %v484_v59 }
  0xf2   : > { %486 = vrot.lane.b32.xlu1 %v485_v60, %s762_s16 }
  0xf3   : > { %v495_v62 = vld [vmem:[#allocation1 + $0x23] ss:$4 sm:$0xff] }
  0xf4   : > { %v499_v63 = vsel %vm382_vm2, %v495_v62, %v496_v61 }
  0xf5   : > { %v500_v0 = vsel %vm384_vm3, %v495_v62, %v499_v63 }
  0xf6   : > { %v501_v1 = vsel %vm386_vm4, %v495_v62, %v500_v0 }
  0xf7   : > { %v502_v2 = vsel %vm388_vm5, %v495_v62, %v501_v1 }
  0xf8   : > { %503 = vrot.lane.b32.xlu2 %v502_v2, %s763_s18 }
 0x132   : > { %v437_v5 = vpop.permute.xlu2 %436 }
 0x13a   : > { %v401_v3 = vpop.permute.xlu0 %400 }
 0x13b   : > { %404 = vst.msk [vmem:[%s946_s15] sm:$0x3] %vm403_vm7, %v401_v3 }
 0x144   : > { %v419_v4 = vpop.permute.xlu1 %418 }
 0x145   : > { %422 = vst.msk [vmem:[%s946_s15] sm:$0x3] %vm421_vm8, %v419_v4 }
 0x146   : > { %440 = vst.msk [vmem:[%s946_s15] sm:$0x3] %vm439_vm9, %v437_v5 }
 0x152   : > { %v504_v8 = vpop.permute.xlu2 %503 }
 0x15a   : > { %v470_v6 = vpop.permute.xlu0 %469 }
 0x15b   : > { %472 = vst.msk [vmem:[%s946_s15 + $0x2] sm:$0x3] %vm403_vm7, %v470_v6 }
 0x164   : > { %v487_v7 = vpop.permute.xlu1 %486 }
 0x165   : > { %489 = vst.msk [vmem:[%s946_s15 + $0x2] sm:$0x3] %vm421_vm8, %v487_v7 }
 0x166   : > { %506 = vst.msk [vmem:[%s946_s15 + $0x2] sm:$0x3] %vm439_vm9, %v504_v8 }
 0x167   : > { %708 = shalt.err (!%p705_p5)
}
 0x168   : > { %623 = dma.vmem_to_hbm [thread:$0]  (%p819_p4), %s524_s26, 64, %s526_s27, %s508_s28  }
 0x169 PF: > { %p629_p6 = scmp.ge.s32.totalorder %s759_s14, 2  ;;  %s537_s6 = sand.u32 1, %s739_s9  }
 0x16a   : > { %s538_s8 = scalar_lea.sflag [#allocation3], %s537_s6 }
 0x16b   : > { %p626_p7 = pnand %p629_p6, %p826_p8 }
 0x16d   : > { %p627_p9 = pneg %p626_p7 }
 0x16f   : > { %734 = dma.done.wait (%p627_p9), %s538_s8, 64  }
 0x170   : > { %736 = vsyncadd (%p627_p9), %s538_s8, 4294967232  ;;  %s15_s14 = sadd.s32 1, %s759_s14   ;;  %s1044_s9 = smov %s743_s10 }
 0x171   : > { %p12_p10 = scmp.ge.s32.totalorder %s15_s14, 4   ;;  %s1045_s10 = smov %s747_s11 }
 0x172   : > { %s1046_s11 = smov %s832_s22  ;;  %s1047_s12 = smov %s755_s13 }
 0x173   : > { %s1048_s13 = smov %s1050_s17  ;;  %14 = sbr.rel (!%p12_p10) target bundleno = 4 (0x4), region = 75 }
 0x178   :  { %544 = vsyncpa [#allocation3], 1 }
 0x179   :  { %546 = vsyncpa [#allocation3 + $0x1], 1 }

</bundles_post_ra>
